<compile_context>
chip_gen: v5e
topology: v5e:2x2
jax: 0.10.0
libtpu: 0.0.40
codegen_flags: <defaults>
</compile_context>

<pallas_src>
import jax
import jax.numpy as jnp
from jax.experimental import pallas as pl
from jax.experimental.pallas import tpu as pltpu


def _round_up(x, m):
    return ((x + m - 1) // m) * m


def _make_kernel(C, S_true, ts, needs_mask):
    def kernel(x_ref, w_ref, b_ref, o_ref, acc_sum, acc_max):
        s_idx = pl.program_id(1)
        last = pl.num_programs(1) - 1

        @pl.when(s_idx == 0)
        def _init():
            acc_sum[...] = jnp.zeros_like(acc_sum)
            acc_max[...] = jnp.full_like(acc_max, -jnp.inf)

        def _accumulate(masked):
            x = x_ref[...].astype(jnp.float32)            # (tn, C, ts)
            if masked:
                # Lane index built once as (1, 1, ts); broadcast in the selects.
                lane = jax.lax.broadcasted_iota(jnp.int32, (1, 1, ts), 2)
                valid = lane < (S_true - s_idx * ts)
                x_s = jnp.where(valid, x, 0.0)
                x_m = jnp.where(valid, x, -jnp.inf)
            else:
                x_s = x
                x_m = x
            acc_sum[...] += jnp.sum(x_s, axis=-1)                              # (tn, C)
            acc_max[...] = jnp.maximum(acc_max[...], jnp.max(x_m, axis=-1))    # (tn, C)

        if needs_mask:
            # Mask only the ragged tail; full tiles stay on the cheap path.
            @pl.when(s_idx < last)
            def _full_tiles():
                _accumulate(False)

            @pl.when(s_idx == last)
            def _tail_tile():
                _accumulate(True)
        else:
            _accumulate(False)

        @pl.when(s_idx == last)
        def _finalize():
            avg = acc_sum[...] * jnp.float32(1.0 / S_true)            # true-S mean
            mx = acc_max[...]
            w = w_ref[...]                                            # (2C, P)
            # Split matmul instead of concat([avg, max]) -> no cross-lane relayout.
            y = jnp.dot(avg, w[:C, :], preferred_element_type=jnp.float32)
            y = y + jnp.dot(mx, w[C:, :], preferred_element_type=jnp.float32)
            y = y + b_ref[...]                                        # bias
            y = jnp.maximum(y, 0.0)                                   # ReLU
            o_ref[...] = jax.nn.sigmoid(y).astype(o_ref.dtype)        # Sigmoid

    return kernel


def pooling1_forward(x, w, b, *, max_ts=2048):
    """x: (N, C, D, H, W); w: (2C, P); b: (P,) -> (N, P, 1, 1, 1) float32.

    x may be f32 or bf16; it is upcast to f32 inside the kernel.
    """
    N, C, D, H, W = x.shape
    S = D * H * W
    P = w.shape[1]
    assert w.shape[0] == 2 * C, "conv weight must have 2*C (=96) input channels"

    # ---- VMEM-derived buffer budget (works across v5e/v6e 128 MiB, v7x 64 MiB) ----
    vmem_cap = 64 * 1024 * 1024
    try:
        vmem_cap = int(getattr(pltpu.get_tpu_info(), "vmem_capacity_bytes", vmem_cap))
    except Exception:
        pass
    # ~30% of VMEM per x buffer -> ~60% when double-buffered; rest for scratch/out/weights.
    x_buf_budget = max(int(vmem_cap * 0.30), 2 * 1024 * 1024)
    vmem_limit = min(int(vmem_cap * 0.90), 128 * 1024 * 1024)

    # ---- batch tiling (parallel axis; >=2 blocks when N>8 so both v7x TCs work) ----
    if N <= 8:
        # TODO(synk): for 2<=N<=8 a second parallel block would need sub-8 sublane
        # output blocks (or output padding); single block is used instead.
        tn = N
    else:
        tn = min(_round_up(pl.cdiv(N, 2), 8), 128)

    # ---- spatial tiling (reduction axis, last in grid; tiles are multiples of 128) ----
    itemsize = jnp.dtype(x.dtype).itemsize
    bytes_per_lane = max(tn * C * itemsize, 1)
    ts_budget = max((x_buf_budget // bytes_per_lane) // 128 * 128, 128)
    max_ts_r = max(_round_up(max_ts, 128), 128)
    if S < 128:
        ts = S                                     # full-dim lane block, no mask needed
    elif S % 128 == 0:
        ts = min(ts_budget, max_ts_r, S)
    else:
        ts = min(ts_budget, max_ts_r, (S // 128) * 128)
    needs_mask = (S % ts) != 0

    # ---- NO padding: edge blocks + in-kernel tail masking handle ragged dims ----
    x3 = x.reshape(N, C, S)
    w = w.astype(jnp.float32)
    b2 = b.reshape(1, P).astype(jnp.float32)

    grid = (pl.cdiv(N, tn), pl.cdiv(S, ts))
    kernel = _make_kernel(C, S, ts, needs_mask)

    cost = pl.CostEstimate(
        flops=3 * N * C * S + 2 * N * (2 * C) * P,
        transcendentals=N * P,
        bytes_accessed=N * C * S * itemsize + 2 * C * P * 4 + P * 4 + N * P * 4,
    )

    out = pl.pallas_call(
        kernel,
        out_shape=jax.ShapeDtypeStruct((N, P), jnp.float32),
        grid_spec=pltpu.PrefetchScalarGridSpec(
            num_scalar_prefetch=0,
            grid=grid,
            in_specs=[
                pl.BlockSpec((tn, C, ts), lambda i, s: (i, 0, s)),   # x tile (streamed)
                pl.BlockSpec((2 * C, P), lambda i, s: (0, 0)),       # weights (resident)
                pl.BlockSpec((1, P), lambda i, s: (0, 0)),           # bias (resident)
            ],
            out_specs=pl.BlockSpec((tn, P), lambda i, s: (i, 0)),
            scratch_shapes=[
                pltpu.VMEM((tn, C), jnp.float32),   # running sum
                pltpu.VMEM((tn, C), jnp.float32),   # running max
            ],
        ),
        compiler_params=pltpu.CompilerParams(
            dimension_semantics=("parallel", "arbitrary"),
            vmem_limit_bytes=vmem_limit,
        ),
        cost_estimate=cost,
    )(x3, w, b2)

    return out.reshape(N, P, 1, 1, 1)


def pooling1_ref(x, w, b):
    # Pure-JAX reference of the same math for a correctness check.
    N, C, D, H, W = x.shape
    x3 = x.reshape(N, C, -1).astype(jnp.float32)
    feat = jnp.concatenate([x3.mean(-1), x3.max(-1)], axis=1)
    y = feat @ w + b[None, :]
    y = jnp.maximum(y, 0.0)
    return (1.0 / (1.0 + jnp.exp(-y))).reshape(N, -1, 1, 1, 1)


if __name__ == "__main__":
    key = jax.random.PRNGKey(0)
    k_x, k_w, k_b = jax.random.split(key, 3)

    # Shapes consistent with the module: cat(avg, max) must be 96 channels -> C=48.
    # in_planes (P) = 32.  S = 3*10*10 = 300 is deliberately NOT a multiple of 128
    # so the multi-step accumulator + last-step tail-mask path is exercised.
    N, C, D, H, W = 2, 48, 3, 10, 10
    P = 32

    x = jax.random.normal(k_x, (N, C, D, H, W), dtype=jnp.float32)
    # Conv3d(96, P, kernel_size=1) weight (P, 96, 1,1,1) -> stored transposed as (96, P).
    w = jax.random.normal(k_w, (2 * C, P), dtype=jnp.float32) * (1.0 / jnp.sqrt(96.0))
    b = jax.random.normal(k_b, (P,), dtype=jnp.float32) * 0.1

    out = pooling1_forward(x, w, b)
    jax.block_until_ready(out)

    ref = pooling1_ref(x, w, b)
    assert out.shape == (N, P, 1, 1, 1)
    assert jnp.allclose(out, ref, atol=1e-4, rtol=1e-4), float(jnp.max(jnp.abs(out - ref)))

    print("KERNEL_OK")
</pallas_src>

<mosaic_0001>
module attributes {stable_mosaic.version = 11 : i64} {
  func.func @kernel(%arg0: i32, %arg1: i32, %arg2: memref<2x48x256xf32, #tpu.memory_space<vmem>>, %arg3: memref<96x32xf32, #tpu.memory_space<vmem>>, %arg4: memref<1x32xf32, #tpu.memory_space<vmem>>, %arg5: memref<2x32xf32, #tpu.memory_space<vmem>>, %arg6: memref<2x48xf32, #tpu.memory_space<vmem>>, %arg7: memref<2x48xf32, #tpu.memory_space<vmem>>) attributes {dimension_semantics = [#tpu.dimension_semantics<parallel>, #tpu.dimension_semantics<arbitrary>], iteration_bounds = array<i64: 1, 2>, scalar_prefetch = 0 : i64, scratch_operands = 2 : i64, tpu.core_type = #tpu.core_type<tc>, window_params = [{transform_indices = @transform_0, window_bounds = array<i64: 2, 48, 256>}, {pipeline_mode = #tpu.pipeline_mode<synchronous>, transform_indices = @transform_1, window_bounds = array<i64: 96, 32>}, {pipeline_mode = #tpu.pipeline_mode<synchronous>, transform_indices = @transform_2, window_bounds = array<i64: 1, 32>}, {transform_indices = @transform_3, window_bounds = array<i64: 2, 32>}]} {
    %c0_i32 = arith.constant 0 : i32
    %0 = arith.cmpi eq, %arg1, %c0_i32 : i32
    %1 = arith.extui %0 : i1 to i32
    %c0_i32_0 = arith.constant 0 : i32
    %2 = arith.cmpi ne, %1, %c0_i32_0 : i32
    scf.if %2 {
      %cst = arith.constant 0.000000e+00 : f32
      %12 = vector.broadcast %cst : f32 to vector<2x48xf32>
      %c0 = arith.constant 0 : index
      %c0_6 = arith.constant 0 : index
      %13 = vector.load %arg6[%c0, %c0_6] : memref<2x48xf32, #tpu.memory_space<vmem>>, vector<2x48xf32>
      tpu.vector_store %arg6[%c0, %c0_6], %12 {strides = array<i32>} : memref<2x48xf32, #tpu.memory_space<vmem>>, vector<2x48xf32>,
      %cst_7 = arith.constant 0xFF800000 : f32
      %14 = vector.broadcast %cst_7 : f32 to vector<2x48xf32>
      %c0_8 = arith.constant 0 : index
      %c0_9 = arith.constant 0 : index
      %15 = vector.load %arg7[%c0_8, %c0_9] : memref<2x48xf32, #tpu.memory_space<vmem>>, vector<2x48xf32>
      tpu.vector_store %arg7[%c0_8, %c0_9], %14 {strides = array<i32>} : memref<2x48xf32, #tpu.memory_space<vmem>>, vector<2x48xf32>,
    } else {
    }
    %c1_i32 = arith.constant 1 : i32
    %3 = arith.cmpi slt, %arg1, %c1_i32 : i32
    %4 = arith.extui %3 : i1 to i32
    %c0_i32_1 = arith.constant 0 : i32
    %5 = arith.cmpi ne, %4, %c0_i32_1 : i32
    scf.if %5 {
      %c0 = arith.constant 0 : index
      %c0_6 = arith.constant 0 : index
      %c0_7 = arith.constant 0 : index
      %12 = vector.load %arg2[%c0, %c0_6, %c0_7] : memref<2x48x256xf32, #tpu.memory_space<vmem>>, vector<2x48x256xf32>
      %c0_8 = arith.constant 0 : index
      %c0_9 = arith.constant 0 : index
      %13 = vector.load %arg6[%c0_8, %c0_9] : memref<2x48xf32, #tpu.memory_space<vmem>>, vector<2x48xf32>
      %cst = arith.constant dense<0.000000e+00> : vector<2x48xf32>
      %14 = vector.multi_reduction <add>, %12, %cst [2] : vector<2x48x256xf32> to vector<2x48xf32>
      %15 = arith.addf %13, %14 : vector<2x48xf32>
      %c0_10 = arith.constant 0 : index
      %c0_11 = arith.constant 0 : index
      %16 = vector.load %arg6[%c0_10, %c0_11] : memref<2x48xf32, #tpu.memory_space<vmem>>, vector<2x48xf32>
      tpu.vector_store %arg6[%c0_10, %c0_11], %15 {strides = array<i32>} : memref<2x48xf32, #tpu.memory_space<vmem>>, vector<2x48xf32>,
      %c0_12 = arith.constant 0 : index
      %c0_13 = arith.constant 0 : index
      %17 = vector.load %arg7[%c0_12, %c0_13] : memref<2x48xf32, #tpu.memory_space<vmem>>, vector<2x48xf32>
      %cst_14 = arith.constant dense<0xFF800000> : vector<2x48xf32>
      %18 = vector.multi_reduction <maximumf>, %12, %cst_14 [2] : vector<2x48x256xf32> to vector<2x48xf32>
      %19 = arith.maximumf %17, %18 : vector<2x48xf32>
      %c0_15 = arith.constant 0 : index
      %c0_16 = arith.constant 0 : index
      %20 = vector.load %arg7[%c0_15, %c0_16] : memref<2x48xf32, #tpu.memory_space<vmem>>, vector<2x48xf32>
      tpu.vector_store %arg7[%c0_15, %c0_16], %19 {strides = array<i32>} : memref<2x48xf32, #tpu.memory_space<vmem>>, vector<2x48xf32>,
    } else {
    }
    %c1_i32_2 = arith.constant 1 : i32
    %6 = arith.cmpi eq, %arg1, %c1_i32_2 : i32
    %7 = arith.extui %6 : i1 to i32
    %c0_i32_3 = arith.constant 0 : i32
    %8 = arith.cmpi ne, %7, %c0_i32_3 : i32
    scf.if %8 {
      %c0 = arith.constant 0 : index
      %c0_6 = arith.constant 0 : index
      %c0_7 = arith.constant 0 : index
      %12 = vector.load %arg2[%c0, %c0_6, %c0_7] : memref<2x48x256xf32, #tpu.memory_space<vmem>>, vector<2x48x256xf32>
      %13 = tpu.iota {dimensions = array<i32: 2>} : vector<1x1x256xi32>
      %c256_i32 = arith.constant 256 : i32
      %14 = arith.muli %arg1, %c256_i32 : i32
      %c300_i32 = arith.constant 300 : i32
      %15 = arith.subi %c300_i32, %14 : i32
      %16 = vector.broadcast %15 : i32 to vector<1x1x256xi32>
      %17 = arith.cmpi slt, %13, %16 : vector<1x1x256xi32>
      %cst = arith.constant 0.000000e+00 : f32
      %18 = vector.shape_cast %17 : vector<1x1x256xi1> to vector<1x1x256xi1>
      %19 = vector.broadcast %18 : vector<1x1x256xi1> to vector<2x48x256xi1>
      %20 = vector.broadcast %cst : f32 to vector<2x48x256xf32>
      %21 = arith.select %19, %12, %20 : vector<2x48x256xi1>, vector<2x48x256xf32>
      %cst_8 = arith.constant 0xFF800000 : f32
      %22 = vector.shape_cast %17 : vector<1x1x256xi1> to vector<1x1x256xi1>
      %23 = vector.broadcast %22 : vector<1x1x256xi1> to vector<2x48x256xi1>
      %24 = vector.broadcast %cst_8 : f32 to vector<2x48x256xf32>
      %25 = arith.select %23, %12, %24 : vector<2x48x256xi1>, vector<2x48x256xf32>
      %c0_9 = arith.constant 0 : index
      %c0_10 = arith.constant 0 : index
      %26 = vector.load %arg6[%c0_9, %c0_10] : memref<2x48xf32, #tpu.memory_space<vmem>>, vector<2x48xf32>
      %cst_11 = arith.constant dense<0.000000e+00> : vector<2x48xf32>
      %27 = vector.multi_reduction <add>, %21, %cst_11 [2] : vector<2x48x256xf32> to vector<2x48xf32>
      %28 = arith.addf %26, %27 : vector<2x48xf32>
      %c0_12 = arith.constant 0 : index
      %c0_13 = arith.constant 0 : index
      %29 = vector.load %arg6[%c0_12, %c0_13] : memref<2x48xf32, #tpu.memory_space<vmem>>, vector<2x48xf32>
      tpu.vector_store %arg6[%c0_12, %c0_13], %28 {strides = array<i32>} : memref<2x48xf32, #tpu.memory_space<vmem>>, vector<2x48xf32>,
      %c0_14 = arith.constant 0 : index
      %c0_15 = arith.constant 0 : index
      %30 = vector.load %arg7[%c0_14, %c0_15] : memref<2x48xf32, #tpu.memory_space<vmem>>, vector<2x48xf32>
      %cst_16 = arith.constant dense<0xFF800000> : vector<2x48xf32>
      %31 = vector.multi_reduction <maximumf>, %25, %cst_16 [2] : vector<2x48x256xf32> to vector<2x48xf32>
      %32 = arith.maximumf %30, %31 : vector<2x48xf32>
      %c0_17 = arith.constant 0 : index
      %c0_18 = arith.constant 0 : index
      %33 = vector.load %arg7[%c0_17, %c0_18] : memref<2x48xf32, #tpu.memory_space<vmem>>, vector<2x48xf32>
      tpu.vector_store %arg7[%c0_17, %c0_18], %32 {strides = array<i32>} : memref<2x48xf32, #tpu.memory_space<vmem>>, vector<2x48xf32>,
    } else {
    }
    %c1_i32_4 = arith.constant 1 : i32
    %9 = arith.cmpi eq, %arg1, %c1_i32_4 : i32
    %10 = arith.extui %9 : i1 to i32
    %c0_i32_5 = arith.constant 0 : i32
    %11 = arith.cmpi ne, %10, %c0_i32_5 : i32
    scf.if %11 {
      %c0 = arith.constant 0 : index
      %c0_6 = arith.constant 0 : index
      %12 = vector.load %arg6[%c0, %c0_6] : memref<2x48xf32, #tpu.memory_space<vmem>>, vector<2x48xf32>
      %cst = arith.constant 0.00333333341 : f32
      %13 = vector.broadcast %cst : f32 to vector<2x48xf32>
      %14 = arith.mulf %12, %13 : vector<2x48xf32>
      %c0_7 = arith.constant 0 : index
      %c0_8 = arith.constant 0 : index
      %15 = vector.load %arg7[%c0_7, %c0_8] : memref<2x48xf32, #tpu.memory_space<vmem>>, vector<2x48xf32>
      %c0_9 = arith.constant 0 : index
      %c0_10 = arith.constant 0 : index
      %16 = vector.load %arg3[%c0_9, %c0_10] : memref<96x32xf32, #tpu.memory_space<vmem>>, vector<96x32xf32>
      %17 = vector.extract_strided_slice %16 {offsets = [0, 0], sizes = [48, 32], strides = [1, 1]} : vector<96x32xf32> to vector<48x32xf32>
      %cst_11 = arith.constant dense<0.000000e+00> : vector<2x32xf32>
      %18 = tpu.matmul %14, %17, %cst_11 {dimension_numbers = #tpu.dot_dimension_numbers<[1], [0], [0], [1], [0, 0, 1, 1], [], []>} : vector<2x48xf32>, vector<48x32xf32>, vector<2x32xf32> -> vector<2x32xf32>
      %19 = vector.extract_strided_slice %16 {offsets = [48, 0], sizes = [48, 32], strides = [1, 1]} : vector<96x32xf32> to vector<48x32xf32>
      %cst_12 = arith.constant dense<0.000000e+00> : vector<2x32xf32>
      %20 = tpu.matmul %15, %19, %cst_12 {dimension_numbers = #tpu.dot_dimension_numbers<[1], [0], [0], [1], [0, 0, 1, 1], [], []>} : vector<2x48xf32>, vector<48x32xf32>, vector<2x32xf32> -> vector<2x32xf32>
      %21 = arith.addf %18, %20 : vector<2x32xf32>
      %c0_13 = arith.constant 0 : index
      %c0_14 = arith.constant 0 : index
      %22 = vector.load %arg4[%c0_13, %c0_14] : memref<1x32xf32, #tpu.memory_space<vmem>>, vector<1x32xf32>
      %23 = vector.broadcast %22 : vector<1x32xf32> to vector<2x32xf32>
      %24 = arith.addf %21, %23 : vector<2x32xf32>
      %cst_15 = arith.constant 0.000000e+00 : f32
      %25 = vector.broadcast %cst_15 : f32 to vector<2x32xf32>
      %26 = arith.maximumf %24, %25 : vector<2x32xf32>
      %27 = arith.negf %26 : vector<2x32xf32>
      %28 = math.exp %27 : vector<2x32xf32>
      %cst_16 = arith.constant 1.000000e+00 : f32
      %29 = vector.broadcast %cst_16 : f32 to vector<2x32xf32>
      %30 = arith.addf %29, %28 : vector<2x32xf32>
      %31 = arith.divf %29, %30 : vector<2x32xf32>
      %c0_17 = arith.constant 0 : index
      %c0_18 = arith.constant 0 : index
      %32 = vector.load %arg5[%c0_17, %c0_18] : memref<2x32xf32, #tpu.memory_space<vmem>>, vector<2x32xf32>
      tpu.vector_store %arg5[%c0_17, %c0_18], %31 {strides = array<i32>} : memref<2x32xf32, #tpu.memory_space<vmem>>, vector<2x32xf32>,
    } else {
    }
    return
  }
  func.func @transform_0(%arg0: i32, %arg1: i32) -> (i32, i32, i32) {
    %c0_i32 = arith.constant 0 : i32
    %c0_i32_0 = arith.constant 0 : i32
    return %arg0, %c0_i32, %arg1 : i32, i32, i32
  }
  func.func @transform_1(%arg0: i32, %arg1: i32) -> (i32, i32) {
    %c0_i32 = arith.constant 0 : i32
    %c0_i32_0 = arith.constant 0 : i32
    %c0_i32_1 = arith.constant 0 : i32
    return %c0_i32, %c0_i32_0 : i32, i32
  }
  func.func @transform_2(%arg0: i32, %arg1: i32) -> (i32, i32) {
    %c0_i32 = arith.constant 0 : i32
    %c0_i32_0 = arith.constant 0 : i32
    %c0_i32_1 = arith.constant 0 : i32
    return %c0_i32, %c0_i32_0 : i32, i32
  }
  func.func @transform_3(%arg0: i32, %arg1: i32) -> (i32, i32) {
    %c0_i32 = arith.constant 0 : i32
    %c0_i32_0 = arith.constant 0 : i32
    return %arg0, %c0_i32 : i32, i32
  }
}

</mosaic_0001>

<bundles_post_ra>
// kernel: tpu_custom_call.1
= control target key start
LH: loop header
LB: loop body
LE: loop exit
PB: predicated region body
PF: predicated region fallthrough
CT: control target
= control target key end

     0   :  { %8 = vsyncpa [#allocation5], 0  ;;  %s1512_s0 = inlined_call_operand.hbm [shape: f32[2,48,300], index: 0, kind: input, shape index: {}]   ;;  %s1513_s1 = inlined_call_operand.vmem [shape: f32[96,32], index: 1, kind: input, shape index: {}]   ;;  %s1514_s2 = inlined_call_operand.vmem [shape: f32[1,32], index: 2, kind: input, shape index: {}]   ;;  %s1515_s3 = inlined_call_operand.hbm [shape: f32[2,32], index: 3, kind: output, shape index: {}]  }
   0x1   :  { %10 = vsyncpa [#allocation5 + $0x1], 0 }
   0x2   :  { %11 = vsyncpa [#allocation6], 0  ;;  %s1066_s12 = smov 0   ;;  %s1068_s13 = smov 0  }
   0x3   :  { %s1070_s14 = smov 0   ;;  %s1072_s15 = smov 0  }
   0x4   :  { %s1074_s16 = smov 0   ;;  %s1076_s17 = smov 0  }
   0x5 LB: > { %s828_s18 = sadd.s32 4294967295, %s1038_s17   ;;  %s26_s19 = sadd.s32 1, %s1034_s16  ;;  %s1038_s17 = sphi %s1076_s17, %s17_s17   ;;  %s1034_s16 = sphi %s1074_s16, %s1526_s16   ;;  %s1030_s15 = sphi %s1072_s15, %s1525_s15   ;;  %s1026_s14 = sphi %s1070_s14, %s1524_s14   ;;  %s1022_s13 = sphi %s1068_s13, %s1523_s13   ;;  %s1018_s12 = sphi %s1066_s12, %s1522_s12  }
   0x6   : > { %p27_p0 = scmp.ge.s32.totalorder %s26_s19, 2  ;;  %s38_s20 = sadd.s32 1, %s1026_s14 }
   0x7   : > { %p45_p1 = scmp.ne.s32.totalorder %s1026_s14, %s1022_s13  ;;  %p46_p2 = scmp.eq.s32.totalorder %s1038_s17, 0 }
   0x8   : > { %s1528_s19 = smov (%p27_p0, %s26_s19), 0  ;;  %p51_p4 = scmp.ne.s32.totalorder %s1022_s13, %s1018_s12 }
   0x9   : > { %p47_p3 = por %p46_p2, %p45_p1  ;;  %s34_s21 = ssub.s32 %s1034_s16, %s1528_s19 }
   0xa   : > { %p52_p5 = scmp.eq.s32.totalorder %s828_s18, 0  ;;  %p36_p6 = scmp.eq.s32.totalorder %s34_s21, 0 }
   0xb   : > { %p830_p8 = scmp.ge.s32.totalorder %s1038_s17, 2 }
   0xc   : > { %p1107_p7 = por %p52_p5, %p51_p4 }
   0xd   : > { %s1112_s23 = scalar_select %p36_p6, %s1026_s14, %s38_s20  }
   0xe   : > { %145 = sbr.rel (%p830_p8) target bundleno = 51 (0x33), region = 24 }
  0x13   : > { %148 = sbr.rel (!%p47_p3) target bundleno = 51 (0x33), region = 28  ;;  %s149_s24 = sand.u32 (%p47_p3), 1, %s1026_s14  }
  0x14   : > { %s831_s25 = sshll.u32 (%p47_p3), %s1034_s16, 1  ;;  %s850_s26 = smul.u32 (%p47_p3), 192, %s149_s24 }
  0x15   : > { %s156_s27 = ssub.s32 (%p47_p3), 3, %s831_s25  ;;  %s1120_s4 = scalar_lea.sflag (%p47_p3), [#allocation5], %s149_s24 }
  0x16   : > { %p157_p9 = scmp.lt.s32.totalorder (%p47_p3), %s156_s27, 2  ;;  %s153_s5 = scalar_lea.vmem (%p47_p3), [#allocation4], %s850_s26 }
  0x18   : > { %s1530_s27 = smov (!%p157_p9, %s156_s27), 2 }
  0x19   : > { %s159_s28 = smul.u32 96, %s1530_s27 }
  0x1b   : > { %s160_s29 = ssub.s32 192, %s159_s28 }
  0x1c   : > { %s161_s30 = sshll.u32 %s160_s29, 4 }
  0x1d   : > { %162 = vsyncadd %s1120_s4, %s161_s30  ;;  %p1123_p10 = scmp.ne.s32.totalorder %s159_s28, 0  ;;  %s849_s7 = sshll.u32 %s1034_s16, 4 }
  0x1e   : > { %s167_s10 = scalar_lea.hbm %s1512_s0, %s849_s7  ;;  %s834_s11 = sshll.u32 %s1530_s27, 3 }
  0x1f   : > { %s170_s12 = sshll.u32 %s167_s10, 4  ;;  %s172_s20 = sshll.u32 %s153_s5, 4  ;;  %s171_s12 = int_to_ptr.hbm [resolvable:$true] %s170_s12  ;;  %s173_s20 = int_to_ptr.vmem [resolvable:$true] %s172_s20 }
  0x20   : > { %s836_s21 = smul.u32 1536, %s1530_s27  ;;  %s936_s28 = sshra.s32 %s173_s20, 4  ;;  %s937_s28 = int_to_ptr.vmem [resolvable:$true] %s936_s28 }
  0x21   : > { %s1040_s30 = smov [#allocation4]  }
  0x22   : > { %s919_s24 = sshrl.u32 %s836_s21, 4  ;;  %s947_s7 = scalar_lea.vmem %s1040_s30, 384 }
  0x23   : > { %s955_s25 = sshll.u32 %s919_s24, 4  ;;  %s922_s26 = sadd.s32 1, %s919_s24 }
  0x24   : > { %p921_p11 = scmp.ne.s32.totalorder %s955_s25, %s836_s21 }
  0x26   : > { %s1532_s26 = smov (!%p921_p11, %s922_s26), %s919_s24 }
  0x27   : > { %s943_s29 = scalar_lea.vmem %s937_s28, %s1532_s26 }
  0x28   : > { %p944_p12 = scmp.ne.s32.totalorder %s937_s28, %s943_s29  ;;  %p949_p1 = scmp.lt.s32.totalorder %s947_s7, %s943_s29 }
  0x2a   : > { %p945_p13 = pnand %p944_p12, %p1123_p10 }
  0x2c   : > { %p946_p0 = pneg %p945_p13 }
  0x2e   : > { %p951_p2 = pnand %p949_p1, %p946_p0 }
  0x30   : > { %954 = shalt.err (!%p951_p2)
}
  0x31   : > { %s1041_s5 = smov 384   ;;  %s1042_s8 = smov 256  }
  0x32   : > { %178 = dma.hbm_to_vmem [thread:$0]  (%p1123_p10), %s171_s12, %s836_s21, %s173_s20, %s1120_s4, %s1041_s5, %s1042_s8, %s834_s11  }
  0x33 PF: > { %p837_p3 = scmp.ge.s32.totalorder %s1038_s17, 1  ;;  %p180_p4 = scmp.lt.s32.totalorder %s1038_s17, 3 }
  0x35   : > { %p181_p5 = pnand %p837_p3, %p180_p4 }
  0x36   : > { %s186_s9 = sand.u32 (!%p181_p5), 1, %s1022_s13  }
  0x37   : > { %184 = sbr.rel (%p181_p5) target bundleno = 634 (0x27a), region = 32  ;;  %s187_s24 = scalar_lea.sflag (!%p181_p5), [#allocation5], %s186_s9 }
  0x38   : > { %s851_s10 = smul.u32 (!%p181_p5), 192, %s186_s9 }
  0x3a   : > { %s1143_s25 = scalar_lea.vmem (!%p181_p5), [#allocation4], %s851_s10 }
  0x3c   : > { %1009 = dma.done.wait (%p1107_p7), %s187_s24, 3072  }
  0x3d   : > { %1011 = vsyncadd (%p1107_p7), %s187_s24, 4294964224  ;;  %p838_p6 = scmp.ne.s32.totalorder %s1030_s15, 0 }
  0x3f   : > { %218 = sbr.rel (%p838_p6) target bundleno = 71 (0x47), region = 40 }
  0x44   : > { %vm219_vm0 = vcmask 386048   ;;  %v1043_v0 = vmov 0.0   ;;  %v1044_v1 = vmov -inf  }
  0x45   : > { %220 = vst.msk [vmem:[#allocation2] sm:$0x3] %vm219_vm0, %v1043_v0 }
  0x46   : > { %221 = vst.msk [vmem:[#allocation3] sm:$0x3] %vm219_vm0, %v1044_v1 }
  0x47 PF: > { %p839_p8 = scmp.ge.s32.totalorder %s1030_s15, 1 }
  0x49   : > { %225 = sbr.rel (%p839_p8) target bundleno = 262 (0x106), region = 44 }
  0x4e   : > { %v234_v2 = vld [vmem:[%s1143_s25 + $0x40] sm:$0xff]  ;;  %v235_v3 = vld [vmem:[%s1143_s25 + $0x48] sm:$0xff]  ;;  %v236_v11 = vld [vmem:[%s1143_s25 + $0x50] sm:$0xff]  ;;  %v299_v62 = vlaneseq  ;;  %vm304_vm1 = vcmask 130112   ;;  %vm308_vm2 = vcmask 195712   ;;  %vm312_vm3 = vcmask 261312  }
  0x4f   : > { %v230_v4 = vld [vmem:[%s1143_s25 + $0x20] sm:$0xff]  ;;  %v263_v5 = vadd.f32 %v235_v3, %v234_v2  ;;  %v231_v6 = vld [vmem:[%s1143_s25 + $0x28] sm:$0xff]  ;;  %v237_v12 = vld [vmem:[%s1143_s25 + $0x58] sm:$0xff]  ;;  %v352_v43 = vmax.f32 %v234_v2, %v235_v3  ;;  %vm316_vm4 = vcmask 326912   ;;  %vm320_vm5 = vcmask 392512  }
  0x50   : > { %v226_v7 = vld [vmem:[%s1143_s25] sm:$0xff]  ;;  %v227_v8 = vld [vmem:[%s1143_s25 + $0x8] sm:$0xff]  ;;  %v257_v9 = vadd.f32 %v231_v6, %v230_v4  ;;  %v232_v13 = vld [vmem:[%s1143_s25 + $0x30] sm:$0xff]  ;;  %v266_v17 = vadd.f32 %v237_v12, %v236_v11  ;;  %v346_v33 = vmax.f32 %v230_v4, %v231_v6  ;;  %v355_v48 = vmax.f32 %v236_v11, %v237_v12 }
  0x51   : > { %v251_v10 = vadd.f32 %v227_v8, %v226_v7  ;;  %264 = vadd.xlane.f32.xlu2 %v263_v5  ;;  %v233_v14 = vld [vmem:[%s1143_s25 + $0x38] sm:$0xff]  ;;  %v228_v15 = vld [vmem:[%s1143_s25 + $0x10] sm:$0xff]  ;;  %v238_v22 = vld [vmem:[%s1143_s25 + $0x60] sm:$0xff]  ;;  %v340_v24 = vmax.f32 %v226_v7, %v227_v8  ;;  %v300_v2 = vand.u32 127, %v299_v62  ;;  %vm333_vm6 = vcmask 1041409  }
  0x52   : > { %258 = vadd.xlane.f32.xlu1 %v257_v9  ;;  %v229_v16 = vld [vmem:[%s1143_s25 + $0x18] sm:$0xff]  ;;  %v260_v18 = vadd.f32 %v233_v14, %v232_v13  ;;  %v240_v20 = vld [vmem:[%s1143_s25 + $0x70] sm:$0xff]  ;;  %v239_v23 = vld [vmem:[%s1143_s25 + $0x68] sm:$0xff]  ;;  %v349_v38 = vmax.f32 %v232_v13, %v233_v14  ;;  %vm337_vm7 = vcmask 386048  }
  0x53   : > { %252 = vadd.xlane.f32.xlu0 %v251_v10  ;;  %v254_v19 = vadd.f32 %v229_v16, %v228_v15  ;;  %v241_v21 = vld [vmem:[%s1143_s25 + $0x78] sm:$0xff]  ;;  %v269_v26 = vadd.f32 %v239_v23, %v238_v22  ;;  %v358_v28 = vmax.f32 %v238_v22, %v239_v23  ;;  %v343_v29 = vmax.f32 %v228_v15, %v229_v16  ;;  %v242_v30 = vld [vmem:[%s1143_s25 + $0x80] sm:$0xff]  ;;  %v243_v31 = vld [vmem:[%s1143_s25 + $0x88] sm:$0xff] }
  0x54   : > { %v272_v25 = vadd.f32 %v241_v21, %v240_v20  ;;  %v361_v27 = vmax.f32 %v240_v20, %v241_v21  ;;  %v364_v32 = vmax.f32 %v242_v30, %v243_v31  ;;  %v275_v34 = vadd.f32 %v243_v31, %v242_v30  ;;  %v244_v35 = vld [vmem:[%s1143_s25 + $0x90] sm:$0xff]  ;;  %v245_v36 = vld [vmem:[%s1143_s25 + $0x98] sm:$0xff]  ;;  %v246_v40 = vld [vmem:[%s1143_s25 + $0xa0] sm:$0xff] }
  0x55   : > { %v367_v37 = vmax.f32 %v244_v35, %v245_v36  ;;  %v278_v39 = vadd.f32 %v245_v36, %v244_v35  ;;  %v247_v41 = vld [vmem:[%s1143_s25 + $0xa8] sm:$0xff]  ;;  %v248_v45 = vld [vmem:[%s1143_s25 + $0xb0] sm:$0xff]  ;;  %v249_v46 = vld [vmem:[%s1143_s25 + $0xb8] sm:$0xff]  ;;  %v302_v3 = vadd.s32 4294967288, %v300_v2  ;;  %v306_v8 = vadd.s32 4294967280, %v300_v2 }
  0x56   : > { %v370_v42 = vmax.f32 %v246_v40, %v247_v41  ;;  %v281_v44 = vadd.f32 %v247_v41, %v246_v40  ;;  %v373_v47 = vmax.f32 %v248_v45, %v249_v46  ;;  %v284_v49 = vadd.f32 %v249_v46, %v248_v45 }
  0x57   : > { %v310_v10 = vadd.s32 4294967272, %v300_v2  ;;  %v314_v12 = vadd.s32 4294967264, %v300_v2  ;;  %v318_v20 = vadd.s32 4294967256, %v300_v2 }
  0x59   : > { %267 = vadd.xlane.f32.xlu2 %v266_v17 }
  0x5a   : > { %261 = vadd.xlane.f32.xlu1 %v260_v18 }
  0x5b   : > { %255 = vadd.xlane.f32.xlu0 %v254_v19 }
  0x61   : > { %341 = vmax.xlane.f32.xlu2 %v340_v24 }
  0x62   : > { %273 = vadd.xlane.f32.xlu1 %v272_v25 }
  0x63   : > { %270 = vadd.xlane.f32.xlu0 %v269_v26 }
  0x69   : > { %362 = vmax.xlane.f32.xlu2 %v361_v27 }
  0x6a   : > { %359 = vmax.xlane.f32.xlu1 %v358_v28 }
  0x6b   : > { %344 = vmax.xlane.f32.xlu0 %v343_v29 }
  0x71   : > { %365 = vmax.xlane.f32.xlu2 %v364_v32 }
  0x72   : > { %347 = vmax.xlane.f32.xlu1 %v346_v33 }
  0x73   : > { %276 = vadd.xlane.f32.xlu0 %v275_v34 }
  0x79   : > { %368 = vmax.xlane.f32.xlu2 %v367_v37 }
  0x7a   : > { %350 = vmax.xlane.f32.xlu1 %v349_v38 }
  0x7b   : > { %279 = vadd.xlane.f32.xlu0 %v278_v39 }
  0x81   : > { %371 = vmax.xlane.f32.xlu2 %v370_v42 }
  0x82   : > { %353 = vmax.xlane.f32.xlu1 %v352_v43 }
  0x83   : > { %282 = vadd.xlane.f32.xlu0 %v281_v44 }
  0x89   : > { %374 = vmax.xlane.f32.xlu2 %v373_v47 }
  0x8a   : > { %356 = vmax.xlane.f32.xlu1 %v355_v48 }
  0x8b   : > { %285 = vadd.xlane.f32.xlu0 %v284_v49 }
  0xc4   : > { %v265_v50 = vpop.xlane.xlu2 %264 }
  0xc5   : > { %v259_v51 = vpop.xlane.xlu1 %258  ;;  %v315_v19 = vperm.slane %v265_v50, %v314_v12 }
  0xc6   : > { %v253_v52 = vpop.xlane.xlu0 %252  ;;  %v307_v13 = vperm.slane %v259_v51, %v306_v8 }
  0xc7   : > { %v301_v9 = vperm.slane %v253_v52, %v300_v2 }
  0xcc   : > { %v1175_v53 = vpop.xlane.xlu2 %267 }
  0xcd   : > { %v262_v54 = vpop.xlane.xlu1 %261  ;;  %v319_v33 = vperm.slane %v1175_v53, %v318_v20 }
  0xce   : > { %v256_v55 = vpop.xlane.xlu0 %255  ;;  %v311_v16 = vperm.slane %v262_v54, %v310_v10 }
  0xcf   : > { %v303_v5 = vperm.slane %v256_v55, %v302_v3 }
  0xd1   : > { %v305_v11 = vsel %vm304_vm1, %v303_v5, %v301_v9 }
  0xd2   : > { %v309_v14 = vsel %vm308_vm2, %v307_v13, %v305_v11 }
  0xd3   : > { %v313_v24 = vsel %vm312_vm3, %v311_v16, %v309_v14 }
  0xd4   : > { %v342_v56 = vpop.xlane.xlu2 %341  ;;  %v317_v36 = vsel %vm316_vm4, %v315_v19, %v313_v24 }
  0xd5   : > { %v274_v57 = vpop.xlane.xlu1 %273  ;;  %v388_v29 = vperm.slane %v342_v56, %v300_v2 }
  0xd6   : > { %v271_v58 = vpop.xlane.xlu0 %270  ;;  %v323_v25 = vperm.slane %v274_v57, %v302_v3  ;;  %v339_v57 = vld [vmem:[#allocation3] sm:$0x3] }
  0xd7   : > { %v322_v26 = vperm.slane %v271_v58, %v300_v2 }
  0xd9   : > { %v324_v41 = vsel %vm304_vm1, %v323_v25, %v322_v26 }
  0xdc   : > { %v363_v59 = vpop.xlane.xlu2 %362 }
  0xdd   : > { %v360_v60 = vpop.xlane.xlu1 %359  ;;  %v400_v22 = vperm.slane %v363_v59, %v302_v3  ;;  %v250_v59 = vld [vmem:[#allocation2] sm:$0x3] }
  0xde   : > { %v345_v61 = vpop.xlane.xlu0 %344  ;;  %v399_v21 = vperm.slane %v360_v60, %v300_v2 }
  0xdf   : > { %v389_v23 = vperm.slane %v345_v61, %v302_v3  ;;  %v321_v61 = vsel %vm320_vm5, %v319_v33, %v317_v36 }
  0xe0   : > { %v401_v37 = vsel %vm304_vm1, %v400_v22, %v399_v21 }
  0xe1   : > { %v390_v38 = vsel %vm304_vm1, %v389_v23, %v388_v29 }
  0xe4   : > { %v366_v63 = vpop.xlane.xlu2 %365 }
  0xe5   : > { %v348_v0 = vpop.xlane.xlu1 %347  ;;  %v402_v28 = vperm.slane %v366_v63, %v306_v8 }
  0xe6   : > { %v277_v1 = vpop.xlane.xlu0 %276  ;;  %v391_v27 = vperm.slane %v348_v0, %v306_v8 }
  0xe7   : > { %v325_v30 = vperm.slane %v277_v1, %v306_v8  ;;  %v403_v43 = vsel %vm308_vm2, %v402_v28, %v401_v37 }
  0xe8   : > { %v392_v42 = vsel %vm308_vm2, %v391_v27, %v390_v38 }
  0xe9   : > { %v326_v45 = vsel %vm308_vm2, %v325_v30, %v324_v41 }
  0xec   : > { %v369_v4 = vpop.xlane.xlu2 %368 }
  0xed   : > { %v351_v6 = vpop.xlane.xlu1 %350  ;;  %v404_v32 = vperm.slane %v369_v4, %v310_v10 }
  0xee   : > { %v280_v7 = vpop.xlane.xlu0 %279  ;;  %v393_v31 = vperm.slane %v351_v6, %v310_v10 }
  0xef   : > { %v327_v34 = vperm.slane %v280_v7, %v310_v10  ;;  %v405_v47 = vsel %vm312_vm3, %v404_v32, %v403_v43 }
  0xf0   : > { %v394_v46 = vsel %vm312_vm3, %v393_v31, %v392_v42 }
  0xf1   : > { %v328_v51 = vsel %vm312_vm3, %v327_v34, %v326_v45 }
  0xf4   : > { %v372_v15 = vpop.xlane.xlu2 %371 }
  0xf5   : > { %v354_v17 = vpop.xlane.xlu1 %353  ;;  %v406_v35 = vperm.slane %v372_v15, %v314_v12 }
  0xf6   : > { %v283_v18 = vpop.xlane.xlu0 %282  ;;  %v395_v39 = vperm.slane %v354_v17, %v314_v12 }
  0xf7   : > { %v329_v40 = vperm.slane %v283_v18, %v314_v12  ;;  %v407_v52 = vsel %vm316_vm4, %v406_v35, %v405_v47 }
  0xf8   : > { %v396_v55 = vsel %vm316_vm4, %v395_v39, %v394_v46 }
  0xf9   : > { %v330_v56 = vsel %vm316_vm4, %v329_v40, %v328_v51 }
  0xfc   : > { %v375_v44 = vpop.xlane.xlu2 %374 }
  0xfd   : > { %v357_v48 = vpop.xlane.xlu1 %356  ;;  %v408_v49 = vperm.slane %v375_v44, %v318_v20 }
  0xfe   : > { %v286_v50 = vpop.xlane.xlu0 %285  ;;  %v397_v53 = vperm.slane %v357_v48, %v318_v20 }
  0xff   : > { %v331_v54 = vperm.slane %v286_v50, %v318_v20  ;;  %v409_v58 = vsel %vm320_vm5, %v408_v49, %v407_v52 }
 0x100   : > { %v398_v60 = vsel %vm320_vm5, %v397_v53, %v396_v55 }
 0x101   : > { %v332_v62 = vsel %vm320_vm5, %v331_v54, %v330_v56  ;;  %v410_v63 = vsel %vm333_vm6, %v409_v58, %v398_v60 }
 0x102   : > { %v334_v0 = vsel %vm333_vm6, %v332_v62, %v321_v61  ;;  %v412_v1 = vmax.f32 %v339_v57, %v410_v63 }
 0x103   : > { %v336_v2 = vadd.f32 %v334_v0, %v250_v59 }
 0x104   : > { %413 = vst.msk [vmem:[#allocation3] sm:$0x3] %vm337_vm7, %v412_v1 }
 0x105   : > { %338 = vst.msk [vmem:[#allocation2] sm:$0x3] %vm337_vm7, %v336_v2 }
 0x106 PF: > { %p840_p7 = scmp.ne.s32.totalorder %s1030_s15, 1 }
 0x107   : > { %s841_s22 = sshll.u32 (!%p840_p7), %s1030_s15, 8 }
 0x108   : > { %417 = sbr.rel (%p840_p7) target bundleno = 628 (0x274), region = 48  ;;  %s446_s27 = ssub.s32 (!%p840_p7), 300, %s841_s22 }
 0x10d   : > { %v442_v3 = vlaneseq  ;;  %v1203_v4 = vld [vmem:[%s1143_s25 + $0x60] sm:$0xff]  ;;  %v447_v6 = vstv %s446_s27  ;;  %v431_v9 = vld [vmem:[%s1143_s25 + $0x68] sm:$0xff]  ;;  %v432_v21 = vld [vmem:[%s1143_s25 + $0x70] sm:$0xff]  ;;  %vm554_vm10 = vcmask 130112   ;;  %vm558_vm11 = vcmask 195712  }
 0x10e   : > { %v1208_v7 = vld [vmem:[%s1143_s25 + $0x20] sm:$0xff]  ;;  %v1219_v12 = vld [vmem:[%s1143_s25 + $0x28] sm:$0xff]  ;;  %v433_v25 = vld [vmem:[%s1143_s25 + $0x78] sm:$0xff]  ;;  %vm562_vm12 = vcmask 261312   ;;  %vm566_vm13 = vcmask 326912   ;;  %vm570_vm14 = vcmask 392512  }
 0x10f   : > { %v1205_v5 = vand.u32 127, %v442_v3  ;;  %v418_v8 = vld [vmem:[%s1143_s25] sm:$0xff]  ;;  %v419_v13 = vld [vmem:[%s1143_s25 + $0x8] sm:$0xff]  ;;  %v420_v28 = vld [vmem:[%s1143_s25 + $0x10] sm:$0xff]  ;;  %vm583_vm15 = vcmask 1041409   ;;  %vm587_vm0 = vcmask 386048  }
 0x110   : > { %v1244_v26 = vld [vmem:[%s1143_s25 + $0x80] sm:$0xff]  ;;  %v1247_v27 = vld [vmem:[%s1143_s25 + $0x88] sm:$0xff]  ;;  %v421_v29 = vld [vmem:[%s1143_s25 + $0x18] sm:$0xff]  ;;  %vm679_vm1 = vcmask 392192   ;;  %vm751_vm5 = vcmask 254976  }
 0x111   : > { %v444_v10 = vadd.s32 128, %v1205_v5  ;;  %vm1214_vm8 = vcmp.lt.s32.totalorder %v1205_v5, %v447_v6  ;;  %v1266_v39 = vld [vmem:[%s1143_s25 + $0x90] sm:$0xff]  ;;  %v1269_v40 = vld [vmem:[%s1143_s25 + $0x98] sm:$0xff]  ;;  %v438_v61 = vld [vmem:[%s1143_s25 + $0xa0] sm:$0xff] }
 0x112   : > { %v466_v14 = vsel %vm1214_vm8, %v1203_v4, 0.0  ;;  %v458_v15 = vsel %vm1214_vm8, %v1208_v7, 0.0  ;;  %v454_v16 = vsel %vm1214_vm8, %v418_v8, 0.0  ;;  %v468_v30 = vsel %vm1214_vm8, %v432_v21, 0.0  ;;  %v1272_v41 = vld [vmem:[%s1143_s25 + $0x30] sm:$0xff]  ;;  %v1275_v42 = vld [vmem:[%s1143_s25 + $0x38] sm:$0xff] }
 0x113   : > { %vm1230_vm9 = vcmp.lt.s32.totalorder %v444_v10, %v447_v6  ;;  %v470_v32 = vsel %vm1214_vm8, %v1244_v26, 0.0  ;;  %v456_v34 = vsel %vm1214_vm8, %v420_v28, 0.0  ;;  %v472_v43 = vsel %vm1214_vm8, %v1266_v39, 0.0  ;;  %v439_v62 = vld [vmem:[%s1143_s25 + $0xa8] sm:$0xff]  ;;  %v426_v63 = vld [vmem:[%s1143_s25 + $0x40] sm:$0xff] }
 0x114   : > { %v467_v18 = vsel %vm1230_vm9, %v431_v9, 0.0  ;;  %v459_v19 = vsel %vm1230_vm9, %v1219_v12, 0.0  ;;  %v455_v20 = vsel %vm1230_vm9, %v419_v13, 0.0  ;;  %v469_v31 = vsel %vm1230_vm9, %v433_v25, 0.0  ;;  %v427_v0 = vld [vmem:[%s1143_s25 + $0x48] sm:$0xff]  ;;  %v671_v17 = vld [vmem:[%s1513_s1 + $0x20] sm:$0xff] }
 0x115   : > { %v521_v22 = vadd.f32 %v467_v18, %v466_v14  ;;  %v509_v23 = vadd.f32 %v459_v19, %v458_v15  ;;  %v503_v24 = vadd.f32 %v455_v20, %v454_v16  ;;  %v471_v33 = vsel %vm1230_vm9, %v1247_v27, 0.0  ;;  %v428_v14 = vld [vmem:[%s1143_s25 + $0x50] sm:$0xff]  ;;  %v429_v15 = vld [vmem:[%s1143_s25 + $0x58] sm:$0xff]  ;;  %v672_v11 = vld [vmem:[%s1513_s1 + $0x28] sm:$0xff] }
 0x116   : > { %v457_v35 = vsel %vm1230_vm9, %v421_v29, 0.0  ;;  %v524_v36 = vadd.f32 %v469_v31, %v468_v30  ;;  %v527_v37 = vadd.f32 %v471_v33, %v470_v32  ;;  %v473_v44 = vsel %vm1230_vm9, %v1269_v40, 0.0  ;;  %v440_v16 = vld [vmem:[%s1143_s25 + $0xb0] sm:$0xff]  ;;  %v441_v18 = vld [vmem:[%s1143_s25 + $0xb8] sm:$0xff]  ;;  %716 = vmatpush.msra.mxu1 %v672_v11 }
 0x117   : > { %522 = vadd.xlane.f32.xlu1 %v521_v22  ;;  %510 = vadd.xlane.f32.xlu2 %v509_v23  ;;  %v506_v38 = vadd.f32 %v457_v35, %v456_v34  ;;  %v478_v45 = vsel %vm1214_vm8, %v418_v8, -inf  ;;  %v479_v46 = vsel %vm1230_vm9, %v419_v13, -inf  ;;  %v460_v47 = vsel %vm1214_vm8, %v1272_v41, 0.0 }
 0x118   : > { %504 = vadd.xlane.f32.xlu0 %v503_v24  ;;  %v461_v48 = vsel %vm1230_vm9, %v1275_v42, 0.0  ;;  %v530_v49 = vadd.f32 %v473_v44, %v472_v43  ;;  %v590_v50 = vmax.f32 %v478_v45, %v479_v46  ;;  %v490_v52 = vsel %vm1214_vm8, %v1203_v4, -inf  ;;  %717 = vmatpush.msra.mxu1 %v671_v17 }
 0x119   : > { %v512_v51 = vadd.f32 %v461_v48, %v460_v47  ;;  %v491_v53 = vsel %vm1230_vm9, %v431_v9, -inf  ;;  %v492_v54 = vsel %vm1214_vm8, %v432_v21, -inf  ;;  %v493_v55 = vsel %vm1230_vm9, %v433_v25, -inf }
 0x11a   : > { %v480_v56 = vsel %vm1214_vm8, %v420_v28, -inf  ;;  %v481_v57 = vsel %vm1230_vm9, %v421_v29, -inf  ;;  %v608_v58 = vmax.f32 %v490_v52, %v491_v53  ;;  %v611_v59 = vmax.f32 %v492_v54, %v493_v55  ;;  %v670_v53 = vld [vmem:[%s1513_s1 + $0x18] sm:$0xff]  ;;  %v669_v54 = vld [vmem:[%s1513_s1 + $0x10] sm:$0xff]  ;;  %v668_v55 = vld [vmem:[%s1513_s1 + $0x8] sm:$0xff] }
 0x11b   : > { %v593_v60 = vmax.f32 %v480_v56, %v481_v57  ;;  %v474_v1 = vsel %vm1214_vm8, %v438_v61, 0.0  ;;  %v475_v2 = vsel %vm1230_vm9, %v439_v62, 0.0  ;;  %v482_v3 = vsel %vm1214_vm8, %v1208_v7, -inf  ;;  %718 = vmatpush.msra.mxu1 %v670_v53  ;;  %v667_v56 = vld [vmem:[%s1513_s1] sm:$0xff] }
 0x11c   : > { %v483_v4 = vsel %vm1230_vm9, %v1219_v12, -inf  ;;  %v462_v6 = vsel %vm1214_vm8, %v426_v63, 0.0  ;;  %v463_v8 = vsel %vm1230_vm9, %v427_v0, 0.0  ;;  %v533_v9 = vadd.f32 %v475_v2, %v474_v1 }
 0x11d   : > { %v596_v10 = vmax.f32 %v482_v3, %v483_v4  ;;  %v515_v13 = vadd.f32 %v463_v8, %v462_v6  ;;  %v464_v7 = vsel %vm1214_vm8, %v428_v14, 0.0  ;;  %v465_v12 = vsel %vm1230_vm9, %v429_v15, 0.0  ;;  %719 = vmatpush.msra.mxu1 %v669_v54  ;;  %v676_v6 = vld [vmem:[%s1513_s1 + $0x48] sm:$0xff]  ;;  %v675_v8 = vld [vmem:[%s1513_s1 + $0x40] sm:$0xff] }
 0x11e   : > { %v476_v19 = vsel %vm1214_vm8, %v440_v16, 0.0  ;;  %v477_v20 = vsel %vm1230_vm9, %v441_v18, 0.0  ;;  %v494_v21 = vsel %vm1214_vm8, %v1244_v26, -inf  ;;  %v495_v22 = vsel %vm1230_vm9, %v1247_v27, -inf }
 0x11f   : > { %525 = vadd.xlane.f32.xlu1 %v524_v36  ;;  %528 = vadd.xlane.f32.xlu2 %v527_v37  ;;  %v518_v23 = vadd.f32 %v465_v12, %v464_v7  ;;  %v536_v24 = vadd.f32 %v477_v20, %v476_v19  ;;  %v614_v25 = vmax.f32 %v494_v21, %v495_v22  ;;  %v496_v28 = vsel %vm1214_vm8, %v1266_v39, -inf  ;;  %v673_v21 = vld [vmem:[%s1513_s1 + $0x30] sm:$0xff] }
 0x120   : > { %507 = vadd.xlane.f32.xlu0 %v506_v38  ;;  %v497_v29 = vsel %vm1230_vm9, %v1269_v40, -inf  ;;  %v486_v26 = vsel %vm1214_vm8, %v426_v63, -inf  ;;  %v487_v27 = vsel %vm1230_vm9, %v427_v0, -inf  ;;  %v484_v30 = vsel %vm1214_vm8, %v1272_v41, -inf  ;;  %720 = vmatpush.msra.mxu1 %v668_v55 }
 0x121   : > { %v485_v31 = vsel %vm1230_vm9, %v1275_v42, -inf  ;;  %v617_v32 = vmax.f32 %v496_v28, %v497_v29  ;;  %v602_v33 = vmax.f32 %v486_v26, %v487_v27  ;;  %v488_v35 = vsel %vm1214_vm8, %v428_v14, -inf }
 0x122   : > { %v599_v34 = vmax.f32 %v484_v30, %v485_v31  ;;  %v489_v36 = vsel %vm1230_vm9, %v429_v15, -inf  ;;  %v500_v37 = vsel %vm1214_vm8, %v440_v16, -inf  ;;  %v501_v38 = vsel %vm1230_vm9, %v441_v18, -inf  ;;  %721 = vmatpush.msra.mxu1 %v667_v56  ;;  %v674_v15 = vld [vmem:[%s1513_s1 + $0x38] sm:$0xff] }
 0x123   : > { %v498_v39 = vsel %vm1214_vm8, %v438_v61, -inf  ;;  %v499_v40 = vsel %vm1230_vm9, %v439_v62, -inf  ;;  %v605_v41 = vmax.f32 %v488_v35, %v489_v36  ;;  %v623_v42 = vmax.f32 %v500_v37, %v501_v38  ;;  %v678_v61 = vld [vmem:[%s1513_s1 + $0x58] sm:$0xff]  ;;  %v677_v62 = vld [vmem:[%s1513_s1 + $0x50] sm:$0xff]  ;;  %v502_v36 = vld [vmem:[#allocation2] sm:$0x3] }
 0x124   : > { %v620_v43 = vmax.f32 %v498_v39, %v499_v40  ;;  %693 = vmatpush.msra.mxu0 %v678_v61  ;;  %v1410_v3 = vadd.s32 4294967272, %v1205_v5  ;;  %v1431_v18 = vadd.s32 4294967256, %v1205_v5 }
 0x126   : > { %694 = vmatpush.msra.mxu0 %v677_v62 }
 0x127   : > { %531 = vadd.xlane.f32.xlu1 %v530_v49  ;;  %591 = vmax.xlane.f32.xlu2 %v590_v50 }
 0x128   : > { %513 = vadd.xlane.f32.xlu0 %v512_v51  ;;  %695 = vmatpush.msra.mxu0 %v676_v6 }
 0x12a   : > { %696 = vmatpush.msra.mxu0 %v675_v8 }
 0x12c   : > { %697 = vmatpush.msra.mxu0 %v674_v15 }
 0x12e   : > { %698 = vmatpush.msra.mxu0 %v673_v21 }
 0x12f   : > { %609 = vmax.xlane.f32.xlu1 %v608_v58  ;;  %612 = vmax.xlane.f32.xlu2 %v611_v59 }
 0x130   : > { %594 = vmax.xlane.f32.xlu0 %v593_v60  ;;  %v1397_v60 = vadd.s32 4294967288, %v1205_v5 }
 0x137   : > { %534 = vadd.xlane.f32.xlu1 %v533_v9  ;;  %597 = vmax.xlane.f32.xlu2 %v596_v10  ;;  %v1419_v9 = vadd.s32 4294967280, %v1205_v5  ;;  %v1422_v10 = vadd.s32 4294967264, %v1205_v5 }
 0x138   : > { %516 = vadd.xlane.f32.xlu0 %v515_v13 }
 0x13f   : > { %519 = vadd.xlane.f32.xlu1 %v518_v23  ;;  %537 = vadd.xlane.f32.xlu2 %v536_v24 }
 0x140   : > { %615 = vmax.xlane.f32.xlu0 %v614_v25 }
 0x147   : > { %618 = vmax.xlane.f32.xlu1 %v617_v32  ;;  %603 = vmax.xlane.f32.xlu2 %v602_v33 }
 0x148   : > { %600 = vmax.xlane.f32.xlu0 %v599_v34 }
 0x14f   : > { %606 = vmax.xlane.f32.xlu1 %v605_v41  ;;  %624 = vmax.xlane.f32.xlu2 %v623_v42 }
 0x150   : > { %621 = vmax.xlane.f32.xlu0 %v620_v43 }
 0x18a   : > { %v523_v44 = vpop.xlane.xlu1 %522  ;;  %v511_v45 = vpop.xlane.xlu2 %510 }
 0x18b   : > { %v505_v46 = vpop.xlane.xlu0 %504  ;;  %v572_v13 = vperm.slane %v523_v44, %v1205_v5  ;;  %v557_v22 = vperm.slane %v511_v45, %v1419_v9 }
 0x18c   : > { %v551_v14 = vperm.slane %v505_v46, %v1205_v5 }
 0x192   : > { %v526_v47 = vpop.xlane.xlu1 %525  ;;  %v529_v48 = vpop.xlane.xlu2 %528 }
 0x193   : > { %v508_v49 = vpop.xlane.xlu0 %507  ;;  %v573_v1 = vperm.slane %v526_v47, %v1397_v60  ;;  %v575_v16 = vperm.slane %v529_v48, %v1419_v9 }
 0x194   : > { %v553_v2 = vperm.slane %v508_v49, %v1397_v60 }
 0x195   : > { %v574_v7 = vsel %vm554_vm10, %v573_v1, %v572_v13 }
 0x196   : > { %v555_v12 = vsel %vm554_vm10, %v553_v2, %v551_v14  ;;  %v576_v25 = vsel %vm558_vm11, %v575_v16, %v574_v7 }
 0x197   : > { %v559_v28 = vsel %vm558_vm11, %v557_v22, %v555_v12 }
 0x19a   : > { %v532_v50 = vpop.xlane.xlu1 %531  ;;  %v1376_v51 = vpop.xlane.xlu2 %591 }
 0x19b   : > { %v514_v52 = vpop.xlane.xlu0 %513  ;;  %v577_v19 = vperm.slane %v532_v50, %v1410_v3  ;;  %v638_v46 = vperm.slane %v1376_v51, %v1205_v5 }
 0x19c   : > { %v561_v20 = vperm.slane %v514_v52, %v1410_v3 }
 0x19d   : > { %v578_v27 = vsel %vm562_vm12, %v577_v19, %v576_v25 }
 0x19e   : > { %v563_v30 = vsel %vm562_vm12, %v561_v20, %v559_v28 }
 0x1a2   : > { %v1390_v57 = vpop.xlane.xlu1 %609  ;;  %v1392_v58 = vpop.xlane.xlu2 %612 }
 0x1a3   : > { %v1394_v59 = vpop.xlane.xlu0 %594  ;;  %v649_v48 = vperm.slane %v1390_v57, %v1205_v5  ;;  %v650_v49 = vperm.slane %v1392_v58, %v1397_v60 }
 0x1a4   : > { %v639_v43 = vperm.slane %v1394_v59, %v1397_v60 }
 0x1a5   : > { %v651_v57 = vsel %vm554_vm10, %v650_v49, %v649_v48 }
 0x1a6   : > { %v640_v11 = vsel %vm554_vm10, %v639_v43, %v638_v46 }
 0x1aa   : > { %v535_v63 = vpop.xlane.xlu1 %534  ;;  %v1405_v0 = vpop.xlane.xlu2 %597 }
 0x1ab   : > { %v517_v4 = vpop.xlane.xlu0 %516  ;;  %v579_v23 = vperm.slane %v535_v63, %v1422_v10  ;;  %v641_v45 = vperm.slane %v1405_v0, %v1419_v9 }
 0x1ac   : > { %v565_v24 = vperm.slane %v517_v4, %v1422_v10 }
 0x1ad   : > { %v580_v34 = vsel %vm566_vm13, %v579_v23, %v578_v27  ;;  %v642_v17 = vsel %vm558_vm11, %v641_v45, %v640_v11 }
 0x1ae   : > { %v567_v35 = vsel %vm566_vm13, %v565_v24, %v563_v30 }
 0x1b2   : > { %v520_v29 = vpop.xlane.xlu1 %519  ;;  %v538_v26 = vpop.xlane.xlu2 %537 }
 0x1b3   : > { %v569_v31 = vperm.slane %v520_v29, %v1431_v18  ;;  %v581_v32 = vperm.slane %v538_v26, %v1431_v18  ;;  %v616_v33 = vpop.xlane.xlu0 %615 }
 0x1b4   : > { %v652_v50 = vperm.slane %v616_v33, %v1419_v9 }
 0x1b5   : > { %v571_v37 = vsel %vm570_vm14, %v569_v31, %v567_v35  ;;  %v582_v38 = vsel %vm570_vm14, %v581_v32, %v580_v34 }
 0x1b6   : > { %v584_v39 = vsel %vm583_vm15, %v582_v38, %v571_v37  ;;  %v653_v61 = vsel %vm558_vm11, %v652_v50, %v651_v57 }
 0x1b7   : > { %v586_v40 = vadd.f32 %v584_v39, %v502_v36 }
 0x1b9   : > { %588 = vst.msk [vmem:[#allocation2] sm:$0x3] %vm587_vm0, %v586_v40 }
 0x1ba   : > { %v619_v41 = vpop.xlane.xlu1 %618  ;;  %v604_v42 = vpop.xlane.xlu2 %603 }
 0x1bb   : > { %v601_v44 = vpop.xlane.xlu0 %600  ;;  %v645_v52 = vperm.slane %v604_v42, %v1422_v10  ;;  %v654_v51 = vperm.slane %v619_v41, %v1410_v3 }
 0x1bc   : > { %v643_v47 = vperm.slane %v601_v44, %v1410_v3  ;;  %v589_v3 = vld [vmem:[#allocation3] sm:$0x3] }
 0x1bd   : > { %v655_v0 = vsel %vm562_vm12, %v654_v51, %v653_v61 }
 0x1be   : > { %v644_v54 = vsel %vm562_vm12, %v643_v47, %v642_v17 }
 0x1bf   : > { %v646_v62 = vsel %vm566_vm13, %v645_v52, %v644_v54 }
 0x1c0   : > { %v664_v53 = vld [vmem:[#allocation2] sm:$0x3] }
 0x1c1   : > { %v665_v55 = vmul.f32 0.0033333334, %v664_v53 }
 0x1c2   : > { %v607_v56 = vpop.xlane.xlu1 %606  ;;  %v625_v5 = vpop.xlane.xlu2 %624 }
 0x1c3   : > { %v647_v58 = vperm.slane %v607_v56, %v1431_v18  ;;  %v622_v59 = vpop.xlane.xlu0 %621  ;;  %v658_v60 = vperm.slane %v625_v5, %v1431_v18  ;;  %843 = vmatmul.msk.f32.vlgmr.msra.gmra.mxu1 %vm679_vm1, %v665_v55 }
 0x1c4   : > { %v656_v63 = vperm.slane %v622_v59, %v1422_v10  ;;  %v912_v10 = vld [vmem:[%s1514_s2] ss:$0 sm:$0xff] }
 0x1c5   : > { %v648_v1 = vsel %vm570_vm14, %v647_v58, %v646_v62 }
 0x1c6   : > { %v657_v2 = vsel %vm566_vm13, %v656_v63, %v655_v0 }
 0x1c7   : > { %v659_v4 = vsel %vm570_vm14, %v658_v60, %v657_v2 }
 0x1c8   : > { %v660_v6 = vsel %vm583_vm15, %v659_v4, %v648_v1 }
 0x1c9   : > { %v662_v8 = vmax.f32 %v589_v3, %v660_v6 }
 0x1cb   : > { %663 = vst.msk [vmem:[#allocation3] sm:$0x3] %vm587_vm0, %v662_v8 }
 0x1d2   : > { %v666_v9 = vld [vmem:[#allocation3] sm:$0x3] }
 0x1d3   : > { %842 = vmatmul.msk.f32.vlgmr.msra.gmra.mxu0 %vm679_vm1, %v666_v9 }
 0x240   : > { %v723_v13 = vpop.f32.mrf.mxu1 }
 0x250   : > { %v700_v14 = vpop.f32.mrf.mxu0 }
 0x251   : > { %v724_v15 = vadd.f32 %v723_v13, %v700_v14 }
 0x253   : > { %v730_v16 = vadd.f32 %v912_v10, %v724_v15 }
 0x255   : > { %v731_v18 = vmax.f32 %v730_v16, 0.0 }
 0x257   : > { %v844_v7 = vmul.f32 -1.442695, %v731_v18 }
 0x259   : > { %913 = vpow2.f32 %v844_v7 }
 0x25f   : > { %v914_v12 = vpop.eup %913 }
 0x260   : > { %v735_v19 = vadd.f32 1.0, %v914_v12 }
 0x262   : > { %915 = vrcp.f32 %v735_v19  ;;  %v747_v23 = vand.u32 2147483648, %v735_v19  ;;  %v745_v25 = vand.u32 2147483647, %v735_v19  ;;  %vm741_vm3 = vweird.f32 %v735_v19 }
 0x264   : > { %v748_v29 = vor.u32 1.1754944e-38, %v747_v23  ;;  %vm746_vm6 = vcmp.eq.f32.partialorder %v745_v25, 8.507059e+37 }
 0x268   : > { %v916_v20 = vpop.eup %915 }
 0x269   : > { %v737_v21 = vmul.f32 %v916_v20, %v735_v19  ;;  %vm742_vm2 = vweird.f32 %v916_v20 }
 0x26a   : > { %vm743_vm4 = vmor %vm741_vm3, %vm742_vm2 }
 0x26b   : > { %v738_v22 = vsub.f32 1.0, %v737_v21 }
 0x26d   : > { %v739_v24 = vmul.f32 %v916_v20, %v738_v22 }
 0x26f   : > { %v740_v28 = vadd.f32 %v916_v20, %v739_v24 }
 0x271   : > { %v744_v26 = vsel %vm743_vm4, %v916_v20, %v740_v28 }
 0x272   : > { %v749_v27 = vsel %vm746_vm6, %v748_v29, %v744_v26 }
 0x273   : > { %752 = vst.msk [vmem:[#allocation7] sm:$0x3] %vm751_vm5, %v749_v27 }
 0x274 PF: > { %p857_p9 = scmp.eq.s32.totalorder %s828_s18, 1  ;;  %s763_s28 = sshll.u32 %s1515_s3, 4  ;;  %s764_s28 = int_to_ptr.hbm [resolvable:$true] %s763_s28 }
 0x275   : > { %s1045_s29 = smov [#allocation7]  }
 0x276   : > { %s761_s30 = sshll.u32 %s1045_s29, 4  ;;  %s762_s30 = int_to_ptr.vmem [resolvable:$true] %s761_s30 }
 0x277   : > { %854 = dma.vmem_to_hbm [thread:$0]  (%p857_p9), %s762_s30, 32, %s764_s28, [#allocation6]  }
 0x278   : > { %1013 = dma.done.wait (%p857_p9), [#allocation6], 32  }
 0x279   : > { %1015 = vsyncadd (%p857_p9), [#allocation6], 4294967264 }
 0x27a PF: > { %s17_s17 = sadd.s32 1, %s1038_s17   ;;  %s1522_s12 = smov %s1022_s13 }
 0x27b   : > { %p14_p10 = scmp.ge.s32.totalorder %s17_s17, 4   ;;  %s1523_s13 = smov %s1026_s14 }
 0x27c   : > { %s1524_s14 = smov %s1112_s23  ;;  %s1525_s15 = smov %s1034_s16 }
 0x27d   : > { %s1526_s16 = smov %s1528_s19  ;;  %16 = sbr.rel (!%p14_p10) target bundleno = 5 (0x5), region = 82 }
 0x282   :  { %777 = vsyncpa [#allocation5], 1 }
 0x283   :  { %779 = vsyncpa [#allocation5 + $0x1], 1 }
 0x284   :  { %780 = vsyncpa [#allocation6], 1 }
 0x285   :  { %782 = vsyncpa [#allocation6 + $0x1], 1 }

</bundles_post_ra>
